<compile_context>
chip_gen: v5e
topology: v5e:2x2
jax: 0.10.0
libtpu: 0.0.40
codegen_flags: <defaults>
</compile_context>

<pallas_src>
import jax
import jax.numpy as jnp
from jax import lax
from jax.experimental import pallas as pl
from jax.experimental.pallas import tpu as pltpu


def _round_up(n, m):
    return ((n + m - 1) // m) * m


def _fisher_tr_kernel(x_ref, ct_ref, csq_ref, labels_ref, out_ref):
    """Per batch-tile partial intra-class loss.

    x_ref      : (TB, D)     feature tile, native dtype (f32 / bf16)
    ct_ref     : (D, Cp)     -2 * centers^T, native dtype, class-padded (resident)
    csq_ref    : (1, Cp)     f32 per-class squared norms (resident)
    labels_ref : (TB, 1)     int32 labels (-1 for padded batch rows)
    out_ref    : (1, 8, 128) f32, this tile's partial intra loss (broadcast)
    """
    x = x_ref[...]                          # native dtype -> MXU at full rate
    labels = labels_ref[...]                # (TB, 1) int32
    tb = x.shape[0]
    cp = ct_ref.shape[1]

    # -2 * x @ centers^T on the MXU; contract dim 1 of x with dim 0 of the
    # pre-transposed RHS (no in-kernel transpose), f32 accumulation.
    xc2 = lax.dot_general(
        x, ct_ref[...],
        dimension_numbers=(((1,), (0,)), ((), ())),
        preferred_element_type=jnp.float32,
    )                                                        # (TB, Cp) f32

    # Per-row select of the single class term: ||c_label||^2 - 2 x . c_label
    classes = lax.broadcasted_iota(jnp.int32, (tb, cp), 1)
    mask = labels == classes                                 # (TB, Cp) bool
    sel = jnp.sum(jnp.where(mask, xc2 + csq_ref[...], 0.0),
                  axis=1, keepdims=True)                     # (TB, 1)

    # ||x_i||^2 from the tile already resident in VMEM.
    xf = x.astype(jnp.float32)
    x_sq = jnp.sum(xf * xf, axis=1, keepdims=True)           # (TB, 1)

    d = jnp.clip(x_sq + sel, 1e-12, 1e12)                    # (TB, 1)
    d = jnp.where(labels >= 0, d, 0.0)                       # padded rows -> 0

    # Lane-dense output block; wrapper reads [.., 0, 0].
    out_ref[...] = jnp.zeros(out_ref.shape, jnp.float32) + jnp.sum(d)


def _pick_batch_tile(B, D, Cp, itemsize):
    """Pick a batch tile from a ~8 MiB VMEM budget (tiles are lane-padded)."""
    budget = 8 * 1024 * 1024
    d_lanes = _round_up(max(D, 1), 128)
    # double-buffered x tile + f32 (TB,Cp)/(TB,D) intermediates (rough)
    per_row = 2 * d_lanes * itemsize + 4 * (Cp + d_lanes) + 64
    tb = max(8, budget // per_row)
    tb = min(tb, 1024)
    if tb >= 256:
        tb = (tb // 256) * 256
    else:
        tb = (tb // 8) * 8
    return tb


def fisher_tr_forward(x, labels, centers,
                      intra_loss_weight=1.0, inter_loss_weight=1.0,
                      *, batch_tile=None):
    """Pallas implementation of FisherTR.forward (inter_class='global').

    Returns (loss, intra_loss, inter_loss, None), matching the PyTorch module.
    """
    B, D = x.shape
    C = centers.shape[0]

    # ---- centers-only math, hoisted out of the kernel (computed once) ----
    c32 = centers.astype(jnp.float32)
    c_sq = jnp.sum(c32 * c32, axis=1)                        # (C,)
    global_center = jnp.mean(c32, axis=0)
    inter_loss = jnp.sum((c32 - global_center) ** 2)

    # ---- class padding to a lane multiple; pre-transpose & pre-scale by -2 ----
    Cp = _round_up(C, 128)
    ct_neg2 = jnp.pad((-2.0 * c32).T.astype(x.dtype), ((0, 0), (0, Cp - C)))
    c_sq_p = jnp.pad(c_sq.reshape(1, C), ((0, 0), (0, Cp - C)))

    # ---- batch tiling / padding ----
    if batch_tile is None:
        batch_tile = _pick_batch_tile(B, D, Cp, jnp.dtype(x.dtype).itemsize)
    tb = min(batch_tile, _round_up(B, 8))
    Bp = _round_up(B, tb)

    labels_2d = labels.astype(jnp.int32).reshape(B, 1)
    if Bp != B:
        pad = Bp - B
        x = jnp.pad(x, ((0, pad), (0, 0)))
        # padded rows get label -1 -> never match a class -> contribute 0
        labels_2d = jnp.pad(labels_2d, ((0, pad), (0, 0)), constant_values=-1)

    nsteps = Bp // tb

    partials = pl.pallas_call(
        _fisher_tr_kernel,
        out_shape=jax.ShapeDtypeStruct((nsteps, 8, 128), jnp.float32),
        grid_spec=pl.GridSpec(
            grid=(nsteps,),
            in_specs=[
                pl.BlockSpec((tb, D), lambda i: (i, 0)),     # x tile
                pl.BlockSpec((D, Cp), lambda i: (0, 0)),     # -2*centers^T (resident)
                pl.BlockSpec((1, Cp), lambda i: (0, 0)),     # ||c||^2 (resident)
                pl.BlockSpec((tb, 1), lambda i: (i, 0)),     # labels tile
            ],
            out_specs=pl.BlockSpec((1, 8, 128), lambda i: (i, 0, 0)),
        ),
        compiler_params=pltpu.CompilerParams(
            # Each step writes its own output block -> safe to shard across
            # TensorCores (v7x dual-TC), no serialized accumulator.
            dimension_semantics=("parallel",),
        ),
    )(x, ct_neg2, c_sq_p, labels_2d)

    intra_loss = jnp.sum(partials[:, 0, 0])
    # NOTE: matches PyTorch exactly — no epsilon on the denominator.
    loss = (intra_loss_weight * intra_loss) / (inter_loss_weight * inter_loss)
    return loss, intra_loss, inter_loss, None


def _reference(x, labels, centers):
    # pure-JAX reference for sanity checking (high-precision matmul)
    C = centers.shape[0]
    distmat = (jnp.sum(x ** 2, axis=1, keepdims=True)
               + jnp.sum(centers ** 2, axis=1)[None, :]
               - 2.0 * jnp.dot(x, centers.T, precision=lax.Precision.HIGHEST))
    mask = labels[:, None] == jnp.arange(C)[None, :]
    intra = jnp.sum(jnp.where(mask, jnp.clip(distmat, 1e-12, 1e12), 0.0))
    gc = jnp.mean(centers, axis=0)
    inter = jnp.sum((centers - gc) ** 2)
    return intra / inter, intra, inter


if __name__ == "__main__":
    num_classes = 10
    feat_dim = 8
    batch = 16

    key = jax.random.PRNGKey(0)
    k_x, k_lbl, k_c = jax.random.split(key, 3)

    x = jax.random.normal(k_x, (batch, feat_dim), dtype=jnp.float32)
    labels = jax.random.randint(k_lbl, (batch,), 0, num_classes, dtype=jnp.int32)
    # deterministic stand-in for nn.Parameter(torch.randn(num_classes, feat_dim))
    centers = jax.random.normal(k_c, (num_classes, feat_dim), dtype=jnp.float32)

    loss, intra, inter, _ = fisher_tr_forward(x, labels, centers)
    jax.block_until_ready((loss, intra, inter))

    ref_loss, ref_intra, ref_inter = _reference(x, labels, centers)
    assert jnp.allclose(intra, ref_intra, rtol=1e-4, atol=1e-4), (intra, ref_intra)
    assert jnp.allclose(inter, ref_inter, rtol=1e-4, atol=1e-4), (inter, ref_inter)
    assert jnp.allclose(loss, ref_loss, rtol=1e-4, atol=1e-4), (loss, ref_loss)

    print("KERNEL_OK")
</pallas_src>

<mosaic_0001>
module attributes {stable_mosaic.version = 11 : i64} {
  func.func @_fisher_tr_kernel(%arg0: i32, %arg1: memref<16x8xf32, #tpu.memory_space<vmem>>, %arg2: memref<8x128xf32, #tpu.memory_space<vmem>>, %arg3: memref<1x128xf32, #tpu.memory_space<vmem>>, %arg4: memref<16x1xi32, #tpu.memory_space<vmem>>, %arg5: memref<1x8x128xf32, #tpu.memory_space<vmem>>) attributes {dimension_semantics = [#tpu.dimension_semantics<parallel>], iteration_bounds = array<i64: 1>, scalar_prefetch = 0 : i64, scratch_operands = 0 : i64, tpu.core_type = #tpu.core_type<tc>, window_params = [{transform_indices = @transform_0, window_bounds = array<i64: 16, 8>}, {pipeline_mode = #tpu.pipeline_mode<synchronous>, transform_indices = @transform_1, window_bounds = array<i64: 8, 128>}, {pipeline_mode = #tpu.pipeline_mode<synchronous>, transform_indices = @transform_2, window_bounds = array<i64: 1, 128>}, {transform_indices = @transform_3, window_bounds = array<i64: 16, 1>}, {transform_indices = @transform_4, window_bounds = array<i64: 1, 8, 128>}]} {
    %c0 = arith.constant 0 : index
    %c0_0 = arith.constant 0 : index
    %0 = vector.load %arg1[%c0, %c0_0] : memref<16x8xf32, #tpu.memory_space<vmem>>, vector<16x8xf32>
    %c0_1 = arith.constant 0 : index
    %c0_2 = arith.constant 0 : index
    %1 = vector.load %arg4[%c0_1, %c0_2] : memref<16x1xi32, #tpu.memory_space<vmem>>, vector<16x1xi32>
    %c0_3 = arith.constant 0 : index
    %c0_4 = arith.constant 0 : index
    %2 = vector.load %arg2[%c0_3, %c0_4] : memref<8x128xf32, #tpu.memory_space<vmem>>, vector<8x128xf32>
    %cst = arith.constant dense<0.000000e+00> : vector<16x128xf32>
    %3 = tpu.matmul %0, %2, %cst {dimension_numbers = #tpu.dot_dimension_numbers<[1], [0], [0], [1], [0, 0, 1, 1], [], []>} : vector<16x8xf32>, vector<8x128xf32>, vector<16x128xf32> -> vector<16x128xf32>
    %4 = tpu.iota {dimensions = array<i32: 1>} : vector<16x128xi32>
    %5 = vector.broadcast %1 : vector<16x1xi32> to vector<16x128xi32>
    %6 = arith.cmpi eq, %5, %4 : vector<16x128xi32>
    %c0_5 = arith.constant 0 : index
    %c0_6 = arith.constant 0 : index
    %7 = vector.load %arg3[%c0_5, %c0_6] : memref<1x128xf32, #tpu.memory_space<vmem>>, vector<1x128xf32>
    %8 = vector.broadcast %7 : vector<1x128xf32> to vector<16x128xf32>
    %9 = arith.addf %3, %8 : vector<16x128xf32>
    %cst_7 = arith.constant 0.000000e+00 : f32
    %10 = vector.broadcast %cst_7 : f32 to vector<16x128xf32>
    %11 = arith.select %6, %9, %10 : vector<16x128xi1>, vector<16x128xf32>
    %cst_8 = arith.constant dense<0.000000e+00> : vector<16xf32>
    %12 = vector.multi_reduction <add>, %11, %cst_8 [1] : vector<16x128xf32> to vector<16xf32>
    %13 = vector.shape_cast %12 : vector<16xf32> to vector<16x1xf32>
    %14 = arith.mulf %0, %0 : vector<16x8xf32>
    %cst_9 = arith.constant dense<0.000000e+00> : vector<16xf32>
    %15 = vector.multi_reduction <add>, %14, %cst_9 [1] : vector<16x8xf32> to vector<16xf32>
    %16 = vector.shape_cast %15 : vector<16xf32> to vector<16x1xf32>
    %17 = arith.addf %16, %13 : vector<16x1xf32>
    %cst_10 = arith.constant 9.99999996E-13 : f32
    %cst_11 = arith.constant 9.99999995E+11 : f32
    %18 = vector.broadcast %cst_10 : f32 to vector<16x1xf32>
    %19 = arith.maximumf %18, %17 : vector<16x1xf32>
    %20 = vector.broadcast %cst_11 : f32 to vector<16x1xf32>
    %21 = arith.minimumf %20, %19 : vector<16x1xf32>
    %c0_i32 = arith.constant 0 : i32
    %22 = vector.broadcast %c0_i32 : i32 to vector<16x1xi32>
    %23 = arith.cmpi sge, %1, %22 : vector<16x1xi32>
    %cst_12 = arith.constant 0.000000e+00 : f32
    %24 = vector.broadcast %cst_12 : f32 to vector<16x1xf32>
    %25 = arith.select %23, %21, %24 : vector<16x1xi1>, vector<16x1xf32>
    %cst_13 = arith.constant 0.000000e+00 : f32
    %26 = vector.broadcast %cst_13 : f32 to vector<1x8x128xf32>
    %27 = vector.shape_cast %25 : vector<16x1xf32> to vector<1x16x1xf32>
    %cst_14 = arith.constant dense<0.000000e+00> : vector<1xf32>
    %28 = vector.multi_reduction <add>, %27, %cst_14 [1, 2] : vector<1x16x1xf32> to vector<1xf32>
    %29 = vector.shape_cast %28 : vector<1xf32> to vector<1x1x1xf32>
    %30 = vector.extract %29[0, 0, 0] : f32 from vector<1x1x1xf32>
    %31 = vector.broadcast %30 : f32 to vector<1x8x128xf32>
    %32 = arith.addf %26, %31 : vector<1x8x128xf32>
    %c0_15 = arith.constant 0 : index
    %c0_16 = arith.constant 0 : index
    %c0_17 = arith.constant 0 : index
    %33 = vector.load %arg5[%c0_15, %c0_16, %c0_17] : memref<1x8x128xf32, #tpu.memory_space<vmem>>, vector<1x8x128xf32>
    tpu.vector_store %arg5[%c0_15, %c0_16, %c0_17], %32 {strides = array<i32>} : memref<1x8x128xf32, #tpu.memory_space<vmem>>, vector<1x8x128xf32>,
    return
  }
  func.func @transform_0(%arg0: i32) -> (i32, i32) {
    %c0_i32 = arith.constant 0 : i32
    %c0_i32_0 = arith.constant 0 : i32
    return %arg0, %c0_i32 : i32, i32
  }
  func.func @transform_1(%arg0: i32) -> (i32, i32) {
    %c0_i32 = arith.constant 0 : i32
    %c0_i32_0 = arith.constant 0 : i32
    %c0_i32_1 = arith.constant 0 : i32
    return %c0_i32, %c0_i32_0 : i32, i32
  }
  func.func @transform_2(%arg0: i32) -> (i32, i32) {
    %c0_i32 = arith.constant 0 : i32
    %c0_i32_0 = arith.constant 0 : i32
    %c0_i32_1 = arith.constant 0 : i32
    return %c0_i32, %c0_i32_0 : i32, i32
  }
  func.func @transform_3(%arg0: i32) -> (i32, i32) {
    %c0_i32 = arith.constant 0 : i32
    %c0_i32_0 = arith.constant 0 : i32
    return %arg0, %c0_i32 : i32, i32
  }
  func.func @transform_4(%arg0: i32) -> (i32, i32, i32) {
    %c0_i32 = arith.constant 0 : i32
    %c0_i32_0 = arith.constant 0 : i32
    %c0_i32_1 = arith.constant 0 : i32
    return %arg0, %c0_i32, %c0_i32_0 : i32, i32, i32
  }
}

</mosaic_0001>

<bundles_post_ra>
// kernel: tpu_custom_call.1
= control target key start
LH: loop header
LB: loop body
LE: loop exit
PB: predicated region body
PF: predicated region fallthrough
CT: control target
= control target key end

     0   :  { %vm37_vm0 = vcmask 64512   ;;  %s210_s0 = inlined_call_operand.vmem [shape: f32[16,8], index: 0, kind: input, shape index: {}]   ;;  %s211_s1 = inlined_call_operand.vmem [shape: f32[8,128], index: 1, kind: input, shape index: {}]   ;;  %s212_s2 = inlined_call_operand.vmem [shape: f32[1,128], index: 2, kind: input, shape index: {}]   ;;  %s213_s3 = inlined_call_operand.vmem [shape: s32[16,1], index: 3, kind: input, shape index: {}]   ;;  %s214_s4 = inlined_call_operand.hbm [shape: f32[1,8,128], index: 4, kind: output, shape index: {}]  }
   0x1   :  { %v22_v0 = vld [vmem:[%s211_s1] sm:$0xff]  ;;  %v19_v2 = vld [vmem:[%s210_s0 + $0x8] sm:$0xff] }
   0x2   :  { %v18_v1 = vld [vmem:[%s210_s0] sm:$0xff]  ;;  %59 = vmatpush.msra.mxu0 %v22_v0  ;;  %125 = vmatpush.msra.mxu1 %v22_v0 }
   0x3   :  { %v20_v3 = vld [vmem:[%s213_s3] sm:$0xff]  ;;  %123 = vmatmul.msk.f32.vlgmr.msra.gmra.mxu0 %vm37_vm0, %v18_v1  ;;  %124 = vmatmul.msk.f32.vlgmr.msra.gmra.mxu1 %vm37_vm0, %v19_v2 }
   0x4   :  { %9 = vsyncpa [#allocation3], 0  ;;  %v158_v4 = vmov 0   ;;  %v21_v5 = vld [vmem:[%s213_s3 + $0x8] sm:$0xff]  ;;  %v73_v6 = vmul.f32 %v18_v1, %v18_v1  ;;  %v74_v8 = vmul.f32 %v19_v2, %v19_v2  ;;  %v23_v10 = vlaneseq  ;;  %v131_v13 = vld [vmem:[%s212_s2] ss:$0 sm:$0xff] }
   0x5   :  { %130 = vset.pattern.permute.xlu0 %v158_v4  ;;  %vm87_vm3 = vcmp.ge.s32.totalorder %v20_v3, 0  ;;  %vm88_vm4 = vcmp.ge.s32.totalorder %v21_v5, 0  ;;  %vm91_vm5 = vcmask 7168   ;;  %s159_s2 = smov [#allocation2]   ;;  %s114_s27 = sshll.u32 %s214_s4, 4  ;;  %s115_s27 = int_to_ptr.hbm [resolvable:$true] %s114_s27 }
   0x6   :  { %26 = vperm.xlu0 %130, %v20_v3   ;;  %v75_v7 = vsel %vm37_vm0, %v73_v6, 0.0  ;;  %v78_v9 = vsel %vm37_vm0, %v74_v8, 0.0  ;;  %v24_v12 = vand.u32 127, %v23_v10  ;;  %s112_s3 = sshll.u32 %s159_s2, 4  ;;  %s113_s3 = int_to_ptr.vmem [resolvable:$true] %s112_s3 }
   0x7   :  { %76 = vadd.xlane.f32.xlu2 %v75_v7 }
   0xe   :  { %29 = vperm.xlu0 %130, %v21_v5  }
   0xf   :  { %79 = vadd.xlane.f32.xlu2 %v78_v9 }
  0x78   :  { %v27_v11 = vpop.permute.xlu0 %26 }
  0x79   :  { %vm31_vm1 = vcmp.eq.s32.totalorder %v27_v11, %v24_v12 }
  0x7a   :  { %v77_v21 = vpop.xlane.xlu2 %76 }
  0x80   :  { %v61_v14 = vpop.f32.mrf.mxu0  ;;  %v64_v17 = vpop.f32.mrf.mxu1 }
  0x81   :  { %v62_v15 = vadd.f32 %v131_v13, %v61_v14  ;;  %v30_v18 = vpop.permute.xlu0 %29  ;;  %v65_v19 = vadd.f32 %v131_v13, %v64_v17 }
  0x82   :  { %vm32_vm2 = vcmp.eq.s32.totalorder %v30_v18, %v24_v12  ;;  %v80_v25 = vpop.xlane.xlu2 %79 }
  0x83   :  { %v67_v16 = vsel %vm31_vm1, %v62_v15, 0.0  ;;  %v68_v20 = vsel %vm32_vm2, %v65_v19, 0.0 }
  0x84   :  { %69 = vadd.xlane.f32.xlu1 %v67_v16 }
  0x8c   :  { %71 = vadd.xlane.f32.xlu1 %v68_v20 }
  0xf7   :  { %v70_v22 = vpop.xlane.xlu1 %69 }
  0xf8   :  { %v81_v23 = vadd.f32 %v77_v21, %v70_v22 }
  0xfa   :  { %v83_v24 = vmax.f32 %v81_v23, 1e-12 }
  0xfc   :  { %v85_v27 = vmin.f32 %v83_v24, 1e+12 }
  0xfe   :  { %v89_v31 = vsel %vm87_vm3, %v85_v27, 0.0 }
  0xff   :  { %v72_v26 = vpop.xlane.xlu1 %71  ;;  %v92_v33 = vsel %vm91_vm5, %v89_v31, 0.0 }
 0x100   :  { %v82_v28 = vadd.f32 %v80_v25, %v72_v26 }
 0x102   :  { %v84_v29 = vmax.f32 %v82_v28, 1e-12 }
 0x104   :  { %v86_v30 = vmin.f32 %v84_v29, 1e+12 }
 0x106   :  { %v90_v32 = vsel %vm88_vm4, %v86_v30, 0.0 }
 0x107   :  { %v93_v34 = vsel %vm91_vm5, %v90_v32, 0.0 }
 0x108   :  { %v94_v35 = vadd.f32 %v93_v34, %v92_v33 }
 0x10a   :  { %95 = vadd.xlane.f32.xlu0 %v94_v35 }
 0x17d   :  { %v96_v36 = vpop.xlane.xlu0 %95 }
 0x17e   :  { %v97_v37 = vrot.slane %v96_v36, 4 }
 0x180   :  { %v98_v38 = vadd.f32 %v97_v37, %v96_v36 }
 0x182   :  { %v99_v39 = vrot.slane %v98_v38, 2 }
 0x184   :  { %v100_v40 = vadd.f32 %v99_v39, %v98_v38 }
 0x186   :  { %v101_v41 = vrot.slane %v100_v40, 1 }
 0x188   :  { %v102_v42 = vadd.f32 %v101_v41, %v100_v40 }
 0x18a   :  { %126 = vpush %v102_v42 }
 0x1bb   :  { %s127_s28 = spop %126 }
 0x1bc   :  { %v104_v43 = vstv %s127_s28 }
 0x1bd   :  { %106 = vst [vmem:[#allocation2] sm:$0xff] %v104_v43 }
 0x1be   :  { %117 = dma.vmem_to_hbm [thread:$0]  %s113_s3, 128, %s115_s27, [#allocation3]  }
 0x1bf   :  { %156 = dma.done.wait [#allocation3], 128  }
 0x1c0   :  { %157 = vsyncadd [#allocation3], 4294967168 }
 0x1c1   :  { %122 = vsyncpa [#allocation3], 1 }

</bundles_post_ra>
